<compile_context>
chip_gen: v6e
topology: v6e:2x2x1
jax: 0.10.0
libtpu: 0.0.40
codegen_flags: <defaults>
</compile_context>

<pallas_src>
import functools

import jax
import jax.numpy as jnp
from jax import lax
from jax.experimental import pallas as pl
from jax.experimental.pallas import tpu as pltpu

LANES = 128
SUBLANES = 8

# Per-input, per-pipeline-buffer block budget (bytes).  4 MiB -> 8192 rows of
# f32 / 16384 rows of bf16.  With 2 inputs x 2 pipeline buffers that is 16 MiB
# of VMEM, comfortably inside the explicit scoped-VMEM limit below on every
# generation while cutting per-step overhead to ~5% of wall time.
BLOCK_BYTES_PER_INPUT = 4 * 1024 * 1024
VMEM_LIMIT_BYTES = 32 * 1024 * 1024


def _jaccard_kernel(x_ref, y_ref, inter_ref, sum_ref, *, rows, needs_mask):
    """Accumulate sum(x*y) and sum(x+y) into lane-dense (8,128) outputs."""
    i = pl.program_id(0)
    row_block = x_ref.shape[0]

    @pl.when(i == 0)
    def _init():
        inter_ref[...] = jnp.zeros_like(inter_ref)
        sum_ref[...] = jnp.zeros_like(sum_ref)

    x = x_ref[...].astype(jnp.float32)
    y = y_ref[...].astype(jnp.float32)
    xy = x * y  # intersection term
    s = x + y   # union = sum(x + y) - sum(x * y); folded in the wrapper

    def accumulate(xy_v, s_v):
        # Fold block rows with cheap VPU adds into vreg-shaped accumulators;
        # the expensive cross-lane reduction happens once, in the wrapper.
        inter_ref[...] += jnp.sum(xy_v.reshape(-1, SUBLANES, LANES), axis=0)
        sum_ref[...] += jnp.sum(s_v.reshape(-1, SUBLANES, LANES), axis=0)

    if needs_mask:
        # Only the final (partial) block can overrun the real row count; gate
        # the mask there so every full block takes the unmasked fast path.
        is_last = i == pl.num_programs(0) - 1

        @pl.when(jnp.logical_not(is_last))
        def _full_block():
            accumulate(xy, s)

        @pl.when(is_last)
        def _boundary_block():
            row0 = i * row_block
            row_ids = row0 + lax.broadcasted_iota(jnp.int32, (row_block, 1), 0)
            valid = row_ids < rows
            accumulate(jnp.where(valid, xy, 0.0), jnp.where(valid, s, 0.0))
    else:
        accumulate(xy, s)


@jax.jit
def jaccard_loss(x, y):
    assert x.shape == y.shape, "x and y must have the same shape"
    n = x.size

    # Dtype-aware geometry (all static at trace time).
    itemsizes = [max(1, jnp.dtype(a.dtype).itemsize) for a in (x, y)]
    # Sub-32-bit dtypes pack along sublanes: f32 -> 8 rows, bf16 -> 16, int8 -> 32.
    granule = SUBLANES * max(max(1, 4 // s) for s in itemsizes)
    max_rows = BLOCK_BYTES_PER_INPUT // (LANES * max(itemsizes))
    max_rows = max(granule, (max_rows // granule) * granule)

    xf = jnp.ravel(x)
    yf = jnp.ravel(y)

    # Rare ragged case: pad up to one (granule x 128) chunk of zeros so the
    # lane-dense reshape is legal and rows is a multiple of the dtype tile
    # granule.  Zeros contribute 0 to both sums, so this is exact.
    chunk = granule * LANES
    rem = n % chunk
    if rem:
        xf = jnp.pad(xf, (0, chunk - rem))
        yf = jnp.pad(yf, (0, chunk - rem))
    rows = xf.size // LANES
    x2d = xf.reshape(rows, LANES)  # free reshape, no extra HBM pass
    y2d = yf.reshape(rows, LANES)

    row_block = min(max_rows, rows)
    num_blocks = pl.cdiv(rows, row_block)
    needs_mask = num_blocks * row_block != rows

    kernel = functools.partial(_jaccard_kernel, rows=rows, needs_mask=needs_mask)

    inter_acc, sum_acc = pl.pallas_call(
        kernel,
        out_shape=(
            jax.ShapeDtypeStruct((SUBLANES, LANES), jnp.float32),
            jax.ShapeDtypeStruct((SUBLANES, LANES), jnp.float32),
        ),
        grid_spec=pltpu.PrefetchScalarGridSpec(
            num_scalar_prefetch=0,
            grid=(num_blocks,),
            in_specs=[
                pl.BlockSpec((row_block, LANES), lambda i: (i, 0)),
                pl.BlockSpec((row_block, LANES), lambda i: (i, 0)),
            ],
            out_specs=[
                pl.BlockSpec((SUBLANES, LANES), lambda i: (0, 0)),
                pl.BlockSpec((SUBLANES, LANES), lambda i: (0, 0)),
            ],
        ),
        compiler_params=pltpu.CompilerParams(
            dimension_semantics=("arbitrary",),
            vmem_limit_bytes=VMEM_LIMIT_BYTES,
        ),
    )(x2d, y2d)

    inter = jnp.sum(inter_acc)
    total = jnp.sum(sum_acc)
    # loss = -sum(x*y) / sum(x + y - x*y); denominator is 0 only when both
    # inputs are all-zero, matching the reference formula's behavior.
    return -(inter / (total - inter))


def _ref_jaccard_loss(x, y):
    x = x.astype(jnp.float32)
    y = y.astype(jnp.float32)
    return -(x * y).sum() / (x + y - x * y).sum()


if __name__ == "__main__":
    key = jax.random.PRNGKey(0)
    kx, ky = jax.random.split(key)
    # NCHW probability maps: batch=2, channels=4, spatial=16x16, values in [0,1].
    x = jax.random.uniform(kx, (2, 4, 16, 16), dtype=jnp.float32)
    y = jax.random.uniform(ky, (2, 4, 16, 16), dtype=jnp.float32)

    loss = jaccard_loss(x, y)
    jax.block_until_ready(loss)

    ref = _ref_jaccard_loss(x, y)
    assert jnp.allclose(loss, ref, rtol=1e-5, atol=1e-6), (loss, ref)

    print("KERNEL_OK")
</pallas_src>

<mosaic_0001>
module attributes {stable_mosaic.version = 11 : i64} {
  func.func @_jaccard_kernel(%arg0: i32, %arg1: memref<16x128xf32, #tpu.memory_space<vmem>>, %arg2: memref<16x128xf32, #tpu.memory_space<vmem>>, %arg3: memref<8x128xf32, #tpu.memory_space<vmem>>, %arg4: memref<8x128xf32, #tpu.memory_space<vmem>>) attributes {dimension_semantics = [#tpu.dimension_semantics<arbitrary>], iteration_bounds = array<i64: 1>, scalar_prefetch = 0 : i64, scratch_operands = 0 : i64, tpu.core_type = #tpu.core_type<tc>, window_params = [{transform_indices = @transform_0, window_bounds = array<i64: 16, 128>}, {transform_indices = @transform_1, window_bounds = array<i64: 16, 128>}, {pipeline_mode = #tpu.pipeline_mode<synchronous>, transform_indices = @transform_2, window_bounds = array<i64: 8, 128>}, {pipeline_mode = #tpu.pipeline_mode<synchronous>, transform_indices = @transform_3, window_bounds = array<i64: 8, 128>}]} {
    %c0_i32 = arith.constant 0 : i32
    %0 = arith.cmpi eq, %arg0, %c0_i32 : i32
    %1 = arith.extui %0 : i1 to i32
    %c0_i32_0 = arith.constant 0 : i32
    %2 = arith.cmpi ne, %1, %c0_i32_0 : i32
    scf.if %2 {
      %cst_13 = arith.constant 0.000000e+00 : f32
      %17 = vector.broadcast %cst_13 : f32 to vector<8x128xf32>
      %c0_14 = arith.constant 0 : index
      %c0_15 = arith.constant 0 : index
      %18 = vector.load %arg3[%c0_14, %c0_15] : memref<8x128xf32, #tpu.memory_space<vmem>>, vector<8x128xf32>
      tpu.vector_store %arg3[%c0_14, %c0_15], %17 {strides = array<i32>} : memref<8x128xf32, #tpu.memory_space<vmem>>, vector<8x128xf32>,
      %cst_16 = arith.constant 0.000000e+00 : f32
      %19 = vector.broadcast %cst_16 : f32 to vector<8x128xf32>
      %c0_17 = arith.constant 0 : index
      %c0_18 = arith.constant 0 : index
      %20 = vector.load %arg4[%c0_17, %c0_18] : memref<8x128xf32, #tpu.memory_space<vmem>>, vector<8x128xf32>
      tpu.vector_store %arg4[%c0_17, %c0_18], %19 {strides = array<i32>} : memref<8x128xf32, #tpu.memory_space<vmem>>, vector<8x128xf32>,
    } else {
    }
    %c0 = arith.constant 0 : index
    %c0_1 = arith.constant 0 : index
    %3 = vector.load %arg1[%c0, %c0_1] : memref<16x128xf32, #tpu.memory_space<vmem>>, vector<16x128xf32>
    %c0_2 = arith.constant 0 : index
    %c0_3 = arith.constant 0 : index
    %4 = vector.load %arg2[%c0_2, %c0_3] : memref<16x128xf32, #tpu.memory_space<vmem>>, vector<16x128xf32>
    %5 = arith.mulf %3, %4 : vector<16x128xf32>
    %6 = arith.addf %3, %4 : vector<16x128xf32>
    %c0_4 = arith.constant 0 : index
    %c0_5 = arith.constant 0 : index
    %7 = vector.load %arg3[%c0_4, %c0_5] : memref<8x128xf32, #tpu.memory_space<vmem>>, vector<8x128xf32>
    %8 = vector.shape_cast %5 : vector<16x128xf32> to vector<2x8x128xf32>
    %cst = arith.constant dense<0.000000e+00> : vector<8x128xf32>
    %9 = vector.multi_reduction <add>, %8, %cst [0] : vector<2x8x128xf32> to vector<8x128xf32>
    %10 = arith.addf %7, %9 : vector<8x128xf32>
    %c0_6 = arith.constant 0 : index
    %c0_7 = arith.constant 0 : index
    %11 = vector.load %arg3[%c0_6, %c0_7] : memref<8x128xf32, #tpu.memory_space<vmem>>, vector<8x128xf32>
    tpu.vector_store %arg3[%c0_6, %c0_7], %10 {strides = array<i32>} : memref<8x128xf32, #tpu.memory_space<vmem>>, vector<8x128xf32>,
    %c0_8 = arith.constant 0 : index
    %c0_9 = arith.constant 0 : index
    %12 = vector.load %arg4[%c0_8, %c0_9] : memref<8x128xf32, #tpu.memory_space<vmem>>, vector<8x128xf32>
    %13 = vector.shape_cast %6 : vector<16x128xf32> to vector<2x8x128xf32>
    %cst_10 = arith.constant dense<0.000000e+00> : vector<8x128xf32>
    %14 = vector.multi_reduction <add>, %13, %cst_10 [0] : vector<2x8x128xf32> to vector<8x128xf32>
    %15 = arith.addf %12, %14 : vector<8x128xf32>
    %c0_11 = arith.constant 0 : index
    %c0_12 = arith.constant 0 : index
    %16 = vector.load %arg4[%c0_11, %c0_12] : memref<8x128xf32, #tpu.memory_space<vmem>>, vector<8x128xf32>
    tpu.vector_store %arg4[%c0_11, %c0_12], %15 {strides = array<i32>} : memref<8x128xf32, #tpu.memory_space<vmem>>, vector<8x128xf32>,
    return
  }
  func.func @transform_0(%arg0: i32) -> (i32, i32) {
    %c0_i32 = arith.constant 0 : i32
    %c0_i32_0 = arith.constant 0 : i32
    return %arg0, %c0_i32 : i32, i32
  }
  func.func @transform_1(%arg0: i32) -> (i32, i32) {
    %c0_i32 = arith.constant 0 : i32
    %c0_i32_0 = arith.constant 0 : i32
    return %arg0, %c0_i32 : i32, i32
  }
  func.func @transform_2(%arg0: i32) -> (i32, i32) {
    %c0_i32 = arith.constant 0 : i32
    %c0_i32_0 = arith.constant 0 : i32
    %c0_i32_1 = arith.constant 0 : i32
    return %c0_i32, %c0_i32_0 : i32, i32
  }
  func.func @transform_3(%arg0: i32) -> (i32, i32) {
    %c0_i32 = arith.constant 0 : i32
    %c0_i32_0 = arith.constant 0 : i32
    %c0_i32_1 = arith.constant 0 : i32
    return %c0_i32, %c0_i32_0 : i32, i32
  }
}

</mosaic_0001>

<bundles_post_ra>
// kernel: jaccard_loss.1
= control target key start
LH: loop header
LB: loop body
LE: loop exit
PB: predicated region body
PF: predicated region fallthrough
CT: control target
= control target key end

     0   :  { %s82_s0 = inlined_call_operand.vmem [shape: f32[16,128], index: 0, kind: input, shape index: {}]   ;;  %s83_s1 = inlined_call_operand.vmem [shape: f32[16,128], index: 1, kind: input, shape index: {}]   ;;  %s84_s2 = inlined_call_operand.vmem [shape: f32[8,128], index: 2, kind: output, shape index: {0}]   ;;  %s85_s3 = inlined_call_operand.vmem [shape: f32[8,128], index: 3, kind: output, shape index: {1}]  }
   0x1   :  { %v19_v0 = vld [vmem:[%s82_s0] sm:$0xff]  ;;  %v20_v1 = vld [vmem:[%s82_s0 + $0x8] sm:$0xff] }
   0x2   :  { %v21_v2 = vld [vmem:[%s83_s1] sm:$0xff]  ;;  %v22_v3 = vld [vmem:[%s83_s1 + $0x8] sm:$0xff] }
   0x3   :  { %v23_v4 = vmul.f32 %v21_v2, %v19_v0  ;;  %v25_v5 = vadd.f32 %v21_v2, %v19_v0  ;;  %v24_v6 = vmul.f32 %v22_v3, %v20_v1  ;;  %v26_v7 = vadd.f32 %v22_v3, %v20_v1 }
   0x5   :  { %v28_v8 = vadd.f32 %v24_v6, %v23_v4  ;;  %v32_v9 = vadd.f32 %v26_v7, %v25_v5 }
   0x7   :  { %30 = vst [vmem:[%s84_s2] sm:$0xff] %v28_v8  ;;  %34 = vst [vmem:[%s85_s3] sm:$0xff] %v32_v9 }

</bundles_post_ra>
